<compile_context>
chip_gen: v5e
topology: v5e:2x2
jax: 0.10.0
libtpu: 0.0.40
codegen_flags: <defaults>
</compile_context>

<pallas_src>
import functools
import math

import jax
import jax.numpy as jnp
from jax import lax
from jax.experimental import pallas as pl
from jax.experimental.pallas import tpu as pltpu

_VMEM_LIMIT = 64 * 1024 * 1024


def _choose_tile(dim, preferred, align):
    """Largest `align`-aligned tile <= preferred that evenly divides dim,
    else the full dim (full dims always satisfy TPU layout constraints)."""
    if dim <= preferred:
        return dim
    t = (preferred // align) * align
    while t >= align:
        if dim % t == 0:
            return t
        t -= align
    return dim


# ----------------------------- Linear kernel ------------------------------ #
def _linear_kernel(x_ref, w_ref, b_ref, o_ref):
    # x block: (tm, Din), w block: (Din, tn), bias block: (1, tn)
    y = jnp.dot(x_ref[...], w_ref[...], preferred_element_type=jnp.float32)
    o_ref[...] = (y + b_ref[...].astype(jnp.float32)).astype(o_ref.dtype)


def pallas_linear(x, w, b, *, tm_pref=256, tn_pref=512, compute_dtype=None):
    """x: (B, S, Din), w: (Din, Dout) [already transposed vs torch], b: (Dout,)."""
    B, S, Din = x.shape
    Dout = w.shape[1]
    out_dtype = x.dtype
    x2 = x.reshape(B * S, Din)
    if compute_dtype is not None:
        x2 = x2.astype(compute_dtype)
        w = w.astype(compute_dtype)

    M = B * S
    tm = _choose_tile(M, tm_pref, 8)       # sublane-aligned M tile
    tn = _choose_tile(Dout, tn_pref, 128)  # lane-aligned N tile
    grid = (M // tm, Dout // tn)

    # TODO(synk): Din (K) is not tiled; for very large model dims add a K axis
    # with a VMEM f32 accumulator (pattern P3).
    out = pl.pallas_call(
        _linear_kernel,
        out_shape=jax.ShapeDtypeStruct((M, Dout), out_dtype),
        grid=grid,
        in_specs=[
            pl.BlockSpec((tm, Din), lambda i, j: (i, 0)),
            pl.BlockSpec((Din, tn), lambda i, j: (0, j)),
            pl.BlockSpec((1, tn), lambda i, j: (0, j)),
        ],
        out_specs=pl.BlockSpec((tm, tn), lambda i, j: (i, j)),
        compiler_params=pltpu.CompilerParams(
            dimension_semantics=("parallel", "parallel"),
            vmem_limit_bytes=_VMEM_LIMIT,
        ),
    )(x2, w, b.reshape(1, Dout))
    return out.reshape(B, S, Dout)


# --------------------------- Flash attention kernel ------------------------ #
def _flash_mha_kernel(*refs, scale, num_heads, masked):
    if masked:
        q_ref, k_ref, v_ref, msk_ref, o_ref, m_sc, l_sc, acc_sc = refs
    else:
        q_ref, k_ref, v_ref, o_ref, m_sc, l_sc, acc_sc = refs
        msk_ref = None

    ki = pl.program_id(2)

    @pl.when(ki == 0)
    def _():
        m_sc[...] = jnp.full_like(m_sc, -jnp.inf)
        l_sc[...] = jnp.zeros_like(l_sc)
        acc_sc[...] = jnp.zeros_like(acc_sc)

    q = q_ref[0] * scale  # (tq, D): scale once per tile, not per (tq, tk) score block
    k = k_ref[0]          # (tk, D)
    v = v_ref[0]          # (tk, D)
    dk = q.shape[-1] // num_heads

    if masked:
        invalid = msk_ref[0] == 0          # (tq, tk) bool, hoisted out of head loop
        neg = jnp.float32(-1e9)

    for h in range(num_heads):             # heads = lane-column slices, no transpose
        lo = h * dk
        qh = q[:, lo:lo + dk]
        kh = k[:, lo:lo + dk]
        vh = v[:, lo:lo + dk]

        # contract last dims of q and k directly (no k.T relayout on the XLU)
        s = lax.dot_general(qh, kh, (((1,), (1,)), ((), ())),
                            preferred_element_type=jnp.float32)
        if masked:
            s = jnp.where(invalid, neg, s)

        m_prev = m_sc[h]                                       # (tq, 1)
        m_new = jnp.maximum(m_prev, jnp.max(s, axis=-1, keepdims=True))
        alpha = jnp.exp(m_prev - m_new)
        p = jnp.exp(s - m_new)
        l_sc[h] = alpha * l_sc[h] + jnp.sum(p, axis=-1, keepdims=True)
        acc_sc[h] = alpha * acc_sc[h] + lax.dot_general(
            p.astype(vh.dtype), vh, (((1,), (0,)), ((), ())),
            preferred_element_type=jnp.float32)
        m_sc[h] = m_new

    @pl.when(ki == pl.num_programs(2) - 1)
    def _():
        for h in range(num_heads):
            inv_l = pl.reciprocal(l_sc[h], approx=True)        # EUP slot, not VPU
            o_ref[0, :, h * dk:(h + 1) * dk] = (acc_sc[h] * inv_l).astype(o_ref.dtype)


def pallas_flash_attention(q, k, v, mask_c, num_heads, scale, *,
                           packed=False, tq_pref=256, tk_pref=512,
                           compute_dtype=None):
    """q/k/v: (B, S, D) lane-dense; mask_c: None or int8 (Bm, S, S), Bm in {1, B}.

    If packed=True, `q` is a fused (B, S, 3*D) [Q|K|V] array (k, v ignored) and
    Q/K/V tiles are read via column-offset BlockSpecs (requires D % 128 == 0).
    """
    if packed:
        B, S, D3 = q.shape
        D = D3 // 3
        assert D % 128 == 0, "packed QKV path requires lane-aligned head span"
        args_qkv = (q, q, q)
    else:
        B, S, D = q.shape
        args_qkv = (q, k, v)
    assert D % num_heads == 0
    dk = D // num_heads
    out_dtype = q.dtype
    if compute_dtype is not None:
        args_qkv = tuple(t.astype(compute_dtype) for t in args_qkv)
        if packed:
            args_qkv = (args_qkv[0],) * 3

    tq = _choose_tile(S, tq_pref, 128)
    tk = _choose_tile(S, tk_pref, 128)
    grid = (B, S // tq, S // tk)
    masked = mask_c is not None

    if packed:
        # last-axis block index is in units of D: 0 -> Q cols, 1 -> K, 2 -> V
        in_specs = [
            pl.BlockSpec((1, tq, D), lambda b, qi, ki: (b, qi, 0)),
            pl.BlockSpec((1, tk, D), lambda b, qi, ki: (b, ki, 1)),
            pl.BlockSpec((1, tk, D), lambda b, qi, ki: (b, ki, 2)),
        ]
    else:
        in_specs = [
            pl.BlockSpec((1, tq, D), lambda b, qi, ki: (b, qi, 0)),
            pl.BlockSpec((1, tk, D), lambda b, qi, ki: (b, ki, 0)),
            pl.BlockSpec((1, tk, D), lambda b, qi, ki: (b, ki, 0)),
        ]
    args = list(args_qkv)
    if masked:
        if mask_c.shape[0] == 1:
            mask_idx = lambda b, qi, ki: (0, qi, ki)   # single copy, batch-shared
        else:
            mask_idx = lambda b, qi, ki: (b, qi, ki)
        in_specs.append(pl.BlockSpec((1, tq, tk), mask_idx))
        args.append(mask_c)

    kernel = functools.partial(_flash_mha_kernel, scale=scale,
                               num_heads=num_heads, masked=masked)

    return pl.pallas_call(
        kernel,
        out_shape=jax.ShapeDtypeStruct((B, S, D), out_dtype),
        grid=grid,
        in_specs=in_specs,
        out_specs=pl.BlockSpec((1, tq, D), lambda b, qi, ki: (b, qi, 0)),
        scratch_shapes=[
            pltpu.VMEM((num_heads, tq, 1), jnp.float32),   # running max
            pltpu.VMEM((num_heads, tq, 1), jnp.float32),   # running sum
            pltpu.VMEM((num_heads, tq, dk), jnp.float32),  # running output acc
        ],
        compiler_params=pltpu.CompilerParams(
            dimension_semantics=("parallel", "parallel", "arbitrary"),
            vmem_limit_bytes=_VMEM_LIMIT,
        ),
    )(*args)


# ----------------------------- Module wrapper ------------------------------ #
def init_params(key, model_dim):
    """Mimics torch.nn.Linear default init; weights stored (D_in, D_out)."""
    bound = 1.0 / math.sqrt(model_dim)
    names = ["q", "k", "v", "o"]
    keys = jax.random.split(key, 2 * len(names))
    params = {}
    for i, n in enumerate(names):
        params[f"w{n}"] = jax.random.uniform(
            keys[2 * i], (model_dim, model_dim), jnp.float32, -bound, bound)
        params[f"b{n}"] = jax.random.uniform(
            keys[2 * i + 1], (model_dim,), jnp.float32, -bound, bound)
    return params


def _prep_mask(mask, B, S):
    """Compact, head-broadcast int8 mask of shape (Bm, S, S); nonzero = keep."""
    if mask is None:
        return None
    m = jnp.asarray(mask)
    if m.ndim == 2:
        m = m[None]
    elif m.ndim == 4:
        if m.shape[1] != 1:
            # TODO(synk): head-dependent masks are not supported by the compact
            # resident-mask path (decoder masks are head-broadcast in practice).
            raise NotImplementedError("head-dependent attention masks not supported")
        m = m[:, 0]
    assert m.ndim == 3 and m.shape[-2:] == (S, S)
    assert m.shape[0] in (1, B)
    return (m != 0).astype(jnp.int8)


def decoder_mha_forward(params, query, key, value, mask, num_heads,
                        compute_dtype=None):
    B, S, D = query.shape
    assert D % num_heads == 0
    scale = 1.0 / math.sqrt(D / num_heads)   # matches math.sqrt(self.d_k)
    mask_c = _prep_mask(mask, B, S)

    if query is key and key is value:
        # Self-attention: fused QKV projection reads the activation once.
        wqkv = jnp.concatenate([params["wq"], params["wk"], params["wv"]], axis=1)
        bqkv = jnp.concatenate([params["bq"], params["bk"], params["bv"]])
        qkv = pallas_linear(query, wqkv, bqkv, compute_dtype=compute_dtype)
        if D % 128 == 0:
            # Feed the packed (B, S, 3D) buffer straight in: no Q/K/V slices in HBM.
            attn = pallas_flash_attention(qkv, None, None, mask_c, num_heads, scale,
                                          packed=True, compute_dtype=compute_dtype)
        else:
            q, k, v = qkv[..., :D], qkv[..., D:2 * D], qkv[..., 2 * D:]
            attn = pallas_flash_attention(q, k, v, mask_c, num_heads, scale,
                                          compute_dtype=compute_dtype)
    else:
        q = pallas_linear(query, params["wq"], params["bq"], compute_dtype=compute_dtype)
        k = pallas_linear(key, params["wk"], params["bk"], compute_dtype=compute_dtype)
        v = pallas_linear(value, params["wv"], params["bv"], compute_dtype=compute_dtype)
        attn = pallas_flash_attention(q, k, v, mask_c, num_heads, scale,
                                      compute_dtype=compute_dtype)

    return pallas_linear(attn, params["wo"], params["bo"], compute_dtype=compute_dtype)


# ---------------------------- pure-JAX reference --------------------------- #
def reference_forward(params, query, key, value, mask, num_heads):
    B, S, D = query.shape
    dk = D // num_heads
    scale = 1.0 / math.sqrt(D / num_heads)

    def lin(x, w, b):
        return jnp.einsum("bsd,de->bse", x, w, precision="highest") + b

    q = lin(query, params["wq"], params["bq"]).reshape(B, S, num_heads, dk).transpose(0, 2, 1, 3)
    k = lin(key, params["wk"], params["bk"]).reshape(B, S, num_heads, dk).transpose(0, 2, 1, 3)
    v = lin(value, params["wv"], params["bv"]).reshape(B, S, num_heads, dk).transpose(0, 2, 1, 3)

    scores = jnp.einsum("bhqd,bhkd->bhqk", q, k, precision="highest") * scale
    if mask is not None:
        m = jnp.broadcast_to(mask, (B, num_heads, S, S)).astype(jnp.float32)
        scores = jnp.where(m == 0, -1e9, scores)
    probs = jax.nn.softmax(scores, axis=-1)
    out = jnp.einsum("bhqk,bhkd->bhqd", probs, v, precision="highest")
    out = out.transpose(0, 2, 1, 3).reshape(B, S, D)
    return lin(out, params["wo"], params["bo"])


# --------------------------------- main ------------------------------------ #
if __name__ == "__main__":
    # Small-shape tests (D not 128-aligned -> sliced QKV path).
    B, S, D, H = 2, 8, 32, 4

    root = jax.random.PRNGKey(0)
    kp, kq, kk, kv, kp2, kx2 = jax.random.split(root, 6)

    params = init_params(kp, D)
    query = jax.random.normal(kq, (B, S, D), jnp.float32)
    key_in = jax.random.normal(kk, (B, S, D), jnp.float32)
    value = jax.random.normal(kv, (B, S, D), jnp.float32)

    # causal decoder mask (1 = keep, 0 = masked), broadcast over batch/heads
    causal = jnp.tril(jnp.ones((S, S), jnp.float32)).reshape(1, 1, S, S)

    out_masked = decoder_mha_forward(params, query, key_in, value, causal, H)
    out_nomask = decoder_mha_forward(params, query, key_in, value, None, H)
    out_self = decoder_mha_forward(params, query, query, query, causal, H)  # fused QKV
    jax.block_until_ready((out_masked, out_nomask, out_self))

    ref_masked = reference_forward(params, query, key_in, value, causal, H)
    ref_nomask = reference_forward(params, query, key_in, value, None, H)
    ref_self = reference_forward(params, query, query, query, causal, H)

    assert out_masked.shape == (B, S, D)
    assert jnp.allclose(out_masked, ref_masked, atol=2e-2, rtol=2e-2)
    assert jnp.allclose(out_nomask, ref_nomask, atol=2e-2, rtol=2e-2)
    assert jnp.allclose(out_self, ref_self, atol=2e-2, rtol=2e-2)

    # Lane-aligned shape (D = 128) -> exercises the packed fused-QKV path.
    B2, S2, D2, H2 = 1, 128, 128, 4
    params2 = init_params(kp2, D2)
    x2 = jax.random.normal(kx2, (B2, S2, D2), jnp.float32)
    causal2 = jnp.tril(jnp.ones((S2, S2), jnp.float32)).reshape(1, 1, S2, S2)

    out_self2 = decoder_mha_forward(params2, x2, x2, x2, causal2, H2)
    jax.block_until_ready(out_self2)
    ref_self2 = reference_forward(params2, x2, x2, x2, causal2, H2)
    assert out_self2.shape == (B2, S2, D2)
    assert jnp.allclose(out_self2, ref_self2, atol=2e-2, rtol=2e-2)

    print("KERNEL_OK")
</pallas_src>

<mosaic_0001>
module attributes {stable_mosaic.version = 11 : i64} {
  func.func @_linear_kernel(%arg0: i32, %arg1: i32, %arg2: memref<16x32xf32, #tpu.memory_space<vmem>>, %arg3: memref<32x32xf32, #tpu.memory_space<vmem>>, %arg4: memref<1x32xf32, #tpu.memory_space<vmem>>, %arg5: memref<16x32xf32, #tpu.memory_space<vmem>>) attributes {dimension_semantics = [#tpu.dimension_semantics<parallel>, #tpu.dimension_semantics<parallel>], iteration_bounds = array<i64: 1, 1>, scalar_prefetch = 0 : i64, scratch_operands = 0 : i64, tpu.core_type = #tpu.core_type<tc>, window_params = [{transform_indices = @transform_0, window_bounds = array<i64: 16, 32>}, {transform_indices = @transform_1, window_bounds = array<i64: 32, 32>}, {transform_indices = @transform_2, window_bounds = array<i64: 1, 32>}, {transform_indices = @transform_3, window_bounds = array<i64: 16, 32>}]} {
    %c0 = arith.constant 0 : index
    %c0_0 = arith.constant 0 : index
    %0 = vector.load %arg2[%c0, %c0_0] : memref<16x32xf32, #tpu.memory_space<vmem>>, vector<16x32xf32>
    %c0_1 = arith.constant 0 : index
    %c0_2 = arith.constant 0 : index
    %1 = vector.load %arg3[%c0_1, %c0_2] : memref<32x32xf32, #tpu.memory_space<vmem>>, vector<32x32xf32>
    %cst = arith.constant dense<0.000000e+00> : vector<16x32xf32>
    %2 = tpu.matmul %0, %1, %cst {dimension_numbers = #tpu.dot_dimension_numbers<[1], [0], [0], [1], [0, 0, 1, 1], [], []>} : vector<16x32xf32>, vector<32x32xf32>, vector<16x32xf32> -> vector<16x32xf32>
    %c0_3 = arith.constant 0 : index
    %c0_4 = arith.constant 0 : index
    %3 = vector.load %arg4[%c0_3, %c0_4] : memref<1x32xf32, #tpu.memory_space<vmem>>, vector<1x32xf32>
    %4 = vector.broadcast %3 : vector<1x32xf32> to vector<16x32xf32>
    %5 = arith.addf %2, %4 : vector<16x32xf32>
    %c0_5 = arith.constant 0 : index
    %c0_6 = arith.constant 0 : index
    %6 = vector.load %arg5[%c0_5, %c0_6] : memref<16x32xf32, #tpu.memory_space<vmem>>, vector<16x32xf32>
    tpu.vector_store %arg5[%c0_5, %c0_6], %5 {strides = array<i32>} : memref<16x32xf32, #tpu.memory_space<vmem>>, vector<16x32xf32>,
    return
  }
  func.func @transform_0(%arg0: i32, %arg1: i32) -> (i32, i32) {
    %c0_i32 = arith.constant 0 : i32
    %c0_i32_0 = arith.constant 0 : i32
    return %arg0, %c0_i32 : i32, i32
  }
  func.func @transform_1(%arg0: i32, %arg1: i32) -> (i32, i32) {
    %c0_i32 = arith.constant 0 : i32
    %c0_i32_0 = arith.constant 0 : i32
    return %c0_i32, %arg1 : i32, i32
  }
  func.func @transform_2(%arg0: i32, %arg1: i32) -> (i32, i32) {
    %c0_i32 = arith.constant 0 : i32
    %c0_i32_0 = arith.constant 0 : i32
    return %c0_i32, %arg1 : i32, i32
  }
  func.func @transform_3(%arg0: i32, %arg1: i32) -> (i32, i32) {
    %c0_i32 = arith.constant 0 : i32
    return %arg0, %arg1 : i32, i32
  }
}

</mosaic_0001>

<bundles_post_ra>
// kernel: tpu_custom_call.1
= control target key start
LH: loop header
LB: loop body
LE: loop exit
PB: predicated region body
PF: predicated region fallthrough
CT: control target
= control target key end

     0   :  { %8 = vsyncpa [#allocation3], 0  ;;  %s249_s0 = inlined_call_operand.hbm [shape: f32[16,32], index: 0, kind: input, shape index: {}]   ;;  %s250_s1 = inlined_call_operand.hbm [shape: f32[32,32], index: 1, kind: input, shape index: {}]   ;;  %s251_s2 = inlined_call_operand.vmem [shape: f32[1,32], index: 2, kind: input, shape index: {}]   ;;  %s252_s3 = inlined_call_operand.hbm [shape: f32[16,32], index: 3, kind: output, shape index: {}]  }
   0x1   :  { %9 = vsyncpa [#allocation6], 0 }
   0x2   :  { %10 = vsyncpa [#allocation4], 0  ;;  %s15_s14 = sshll.u32 %s249_s0, 4  ;;  %s199_s15 = smov [#allocation2]   ;;  %s16_s14 = int_to_ptr.hbm [resolvable:$true] %s15_s14 }
   0x3   :  { %s17_s16 = sshll.u32 %s199_s15, 4  ;;  %s28_s19 = sshll.u32 %s250_s1, 4  ;;  %s18_s16 = int_to_ptr.vmem [resolvable:$true] %s17_s16  ;;  %s29_s19 = int_to_ptr.hbm [resolvable:$true] %s28_s19 }
   0x4   :  { %s200_s20 = smov 128   ;;  %s201_s21 = smov 8  }
   0x5   :  { %23 = dma.hbm_to_vmem [thread:$0]  %s16_s14, 256, %s18_s16, [#allocation3], %s200_s20, %s200_s20, %s201_s21  }
   0x6   :  { %s202_s22 = smov [#allocation5]  }
   0x7   :  { %s30_s23 = sshll.u32 %s202_s22, 4  ;;  %s31_s23 = int_to_ptr.vmem [resolvable:$true] %s30_s23 }
   0x8   :  { %36 = dma.hbm_to_vmem [thread:$0]  %s29_s19, 512, %s31_s23, [#allocation6], %s200_s20, %s200_s20, %s201_s21  }
   0x9   :  { %193 = dma.done.wait [#allocation3], 256  }
   0xa   :  { %194 = vsyncadd [#allocation3], 4294967040 }
   0xb   :  { %195 = dma.done.wait [#allocation6], 512  }
   0xc   :  { %196 = vsyncadd [#allocation6], 4294966784  ;;  %v52_v0 = vld [vmem:[#allocation5 + $0x18] sm:$0xff]  ;;  %v51_v1 = vld [vmem:[#allocation5 + $0x10] sm:$0xff]  ;;  %vm57_vm0 = vcmask 261120   ;;  %s203_s24 = smov [#allocation7]  }
   0xd   :  { %76 = vmatpush.msra.mxu0 %v52_v0  ;;  %111 = vmatpush.msra.mxu1 %v52_v0  ;;  %v50_v2 = vld [vmem:[#allocation5 + $0x8] sm:$0xff]  ;;  %v49_v3 = vld [vmem:[#allocation5] sm:$0xff]  ;;  %v47_v4 = vld [vmem:[#allocation2] sm:$0xff]  ;;  %s93_s25 = sshll.u32 %s203_s24, 4  ;;  %s95_s28 = sshll.u32 %s252_s3, 4  ;;  %s94_s25 = int_to_ptr.vmem [resolvable:$true] %s93_s25  ;;  %s96_s28 = int_to_ptr.hbm [resolvable:$true] %s95_s28 }
   0xe   :  { %v48_v5 = vld [vmem:[#allocation2 + $0x8] sm:$0xff]  ;;  %v120_v6 = vld [vmem:[%s251_s2] ss:$0 sm:$0xff] }
   0xf   :  { %77 = vmatpush.msra.mxu0 %v51_v1  ;;  %112 = vmatpush.msra.mxu1 %v51_v1 }
  0x11   :  { %78 = vmatpush.msra.mxu0 %v50_v2  ;;  %113 = vmatpush.msra.mxu1 %v50_v2 }
  0x13   :  { %79 = vmatpush.msra.mxu0 %v49_v3  ;;  %114 = vmatpush.msra.mxu1 %v49_v3 }
  0x14   :  { %109 = vmatmul.msk.f32.vlgmr.msra.gmra.mxu0 %vm57_vm0, %v47_v4  ;;  %110 = vmatmul.msk.f32.vlgmr.msra.gmra.mxu1 %vm57_vm0, %v48_v5 }
  0x91   :  { %v81_v7 = vpop.f32.mrf.mxu0  ;;  %v84_v8 = vpop.f32.mrf.mxu1 }
  0x92   :  { %v82_v9 = vadd.f32 %v120_v6, %v81_v7  ;;  %v85_v10 = vadd.f32 %v120_v6, %v84_v8 }
  0x94   :  { %87 = vst.msk [vmem:[#allocation7] sm:$0xff] %vm57_vm0, %v82_v9 }
  0x95   :  { %88 = vst.msk [vmem:[#allocation7 + $0x8] sm:$0xff] %vm57_vm0, %v85_v10 }
  0x96   :  { %101 = dma.vmem_to_hbm [thread:$0]  %s94_s25, 256, %s96_s28, [#allocation4], %s200_s20, %s200_s20, %s201_s21  }
  0x97   :  { %197 = dma.done.wait [#allocation4], 256  }
  0x98   :  { %198 = vsyncadd [#allocation4], 4294967040 }
  0x99   :  { %106 = vsyncpa [#allocation3], 1 }
  0x9a   :  { %107 = vsyncpa [#allocation6], 1 }
  0x9b   :  { %108 = vsyncpa [#allocation4], 1 }

</bundles_post_ra>
